<compile_context>
chip_gen: v5e
topology: v5e:2x2
jax: 0.10.0
libtpu: 0.0.40
codegen_flags: <defaults>
</compile_context>

<pallas_src>
import functools
import math

import jax
import jax.numpy as jnp
from jax.experimental import pallas as pl
from jax.experimental.pallas import tpu as pltpu

EMB = 64          # embedding width of both encoders
MLP_H2 = 32       # second hidden width of the MLP
OUT_LANES = 128   # single lane-dense output row


def _round_up(x, m):
    return ((x + m - 1) // m) * m


def binary_classifier_kernel(xin_ref, p_ref, out_ref, *, nf, w2_off, bias_off):
    f32 = jnp.float32
    x = xin_ref[...].astype(f32)                       # (2B, DQ+DA): rows [0:B] pos, [B:2B] neg

    # Static sublane slices out of the single packed parameter slab.
    w_fold = p_ref[0:nf, :]                            # (DQ+DA, 64) folded encoders @ W1
    w2 = p_ref[w2_off:w2_off + EMB, :]                 # (64, 64), lanes 32:64 zero-padded
    b_fold = p_ref[bias_off + 0:bias_off + 1, :]       # (1, 64)
    b2 = p_ref[bias_off + 1:bias_off + 2, :]           # (1, 64), lanes 32:64 zero
    w3 = p_ref[bias_off + 2:bias_off + 3, :]           # (1, 64), lanes 32:64 zero
    b3 = p_ref[bias_off + 3:bias_off + 4, 0:1]         # (1, 1)

    # h = ReLU([q | aud] @ W_fold + b_fold)  -- whole pre-ReLU affine chain, one MXU push.
    h = jnp.maximum(jnp.dot(x, w_fold, preferred_element_type=f32) + b_fold, 0.0)
    # h = ReLU(h @ W2 + b2)  (zero-padded lanes 32:64 stay exactly zero through the ReLU).
    h = jnp.maximum(jnp.dot(h, w2, preferred_element_type=f32) + b2, 0.0)

    # Final Linear(32,1) for all 2B rows in one transposed matmul -> lane-dense (1, 2B).
    z = jax.lax.dot_general(w3, h, (((1,), (1,)), ((), ())),
                            preferred_element_type=f32) + b3           # (1, 2B)
    pred = 0.5 * (jnp.tanh(0.5 * z) + 1.0)             # exact sigmoid, single EUP push

    # BCELoss (mean): lanes [0:B] have label 1, lanes [B:2B] label 0. Select BEFORE log.
    n = pred.shape[1]
    eps = 1e-7
    p = jnp.clip(pred, eps, 1.0 - eps)
    lane = jax.lax.broadcasted_iota(jnp.int32, (1, n), 1)
    per_lane = jnp.log(jnp.where(lane < n // 2, p, 1.0 - p))           # one log push
    loss = -jnp.sum(per_lane) / n

    # Single lane-dense (1, 128) output row: unmasked full store of the loss, then the
    # 2B prediction lanes. Wrapper reads pred from lanes [0:2B], loss from lane 127.
    out_ref[...] = jnp.full((1, OUT_LANES), loss, dtype=f32)
    out_ref[0:1, 0:n] = pred


def pack_params(params, dq, da):
    """Fold the pre-ReLU affine chain and pack every parameter into one (R, 64) slab.

    Exact only because the synthetic landmark/audio encoders are single Linear layers,
    so encoder -> concat -> Linear(128,64) is a single affine map.  Runs once at init.
    """
    f32 = jnp.float32
    w1 = params["w1"].astype(f32)                            # (128, 64)
    wq_fold = params["w_mouth"].astype(f32) @ w1[:EMB]       # (dq, 64)
    wa_fold = params["w_aud"].astype(f32) @ w1[EMB:]         # (da, 64)
    b_fold = (params["b_mouth"].astype(f32) @ w1[:EMB]
              + params["b_aud"].astype(f32) @ w1[EMB:]
              + params["b1"].astype(f32))                    # (1, 64)

    nf = dq + da
    nf_pad = _round_up(nf, 8)
    w_fold = jnp.zeros((nf_pad, EMB), f32)
    w_fold = w_fold.at[:dq].set(wq_fold).at[dq:nf].set(wa_fold)

    w2_pad = jnp.zeros((EMB, EMB), f32).at[:, :MLP_H2].set(params["w2"].astype(f32))
    b2_pad = jnp.zeros((1, EMB), f32).at[:, :MLP_H2].set(params["b2"].astype(f32))
    w3_pad = jnp.zeros((1, EMB), f32).at[:, :MLP_H2].set(
        params["w3"].reshape(1, MLP_H2).astype(f32))
    b3_pad = jnp.zeros((1, EMB), f32).at[:, :1].set(params["b3"].astype(f32))

    bias_block = jnp.concatenate(
        [b_fold, b2_pad, w3_pad, b3_pad, jnp.zeros((4, EMB), f32)], axis=0)   # (8, 64)
    packed = jnp.concatenate([w_fold, w2_pad, bias_block], axis=0)            # (R, 64)
    offsets = dict(nf=nf, w2_off=nf_pad, bias_off=nf_pad + EMB)
    return packed, offsets


def make_binary_classifier_forward(params, dq, da):
    # All parameter packing / folding is hoisted out of the per-call path.
    packed, offs = pack_params(params, dq, da)
    kernel = functools.partial(binary_classifier_kernel, nf=offs["nf"],
                               w2_off=offs["w2_off"], bias_off=offs["bias_off"])
    vmem = pl.BlockSpec(memory_space=pltpu.MemorySpace.VMEM)

    @jax.jit
    def forward(query, positive, negative):
        B = query.shape[0]
        assert 2 * B < OUT_LANES
        f32 = jnp.float32
        # [q | pos] stacked over [q | neg]: one (2B, DQ+DA) activation input.
        xin = jnp.concatenate(
            [jnp.concatenate([query, positive], axis=1),
             jnp.concatenate([query, negative], axis=1)], axis=0).astype(f32)

        out = pl.pallas_call(
            kernel,
            out_shape=jax.ShapeDtypeStruct((1, OUT_LANES), f32),
            in_specs=[vmem, vmem],
            out_specs=vmem,
        )(xin, packed)

        pred = out[0, :2 * B]            # torch.squeeze(vstack([pos_x, neg_x]))
        loss = out[0, OUT_LANES - 1]
        # Labels are data-independent constants: built outside the kernel.
        labels = jnp.concatenate([jnp.ones((B,), f32), jnp.zeros((B,), f32)])
        return loss, pred, labels

    return forward


def _linear_params(key, fan_in, fan_out):
    kw, kb = jax.random.split(key)
    bound = 1.0 / math.sqrt(fan_in)
    w = jax.random.uniform(kw, (fan_in, fan_out), jnp.float32, -bound, bound)
    b = jax.random.uniform(kb, (1, fan_out), jnp.float32, -bound, bound)
    return w, b


def init_params(key, dq, da):
    keys = jax.random.split(key, 5)
    w_mouth, b_mouth = _linear_params(keys[0], dq, EMB)   # landmark_enc mouth head
    w_aud, b_aud = _linear_params(keys[1], da, EMB)       # audnet
    w1, b1 = _linear_params(keys[2], 2 * EMB, EMB)        # Linear(128, 64)
    w2, b2 = _linear_params(keys[3], EMB, MLP_H2)         # Linear(64, 32)
    w3, b3 = _linear_params(keys[4], MLP_H2, 1)           # Linear(32, 1)  (see TODO)
    return dict(w_mouth=w_mouth, b_mouth=b_mouth, w_aud=w_aud, b_aud=b_aud,
                w1=w1, b1=b1, w2=w2, b2=b2, w3=w3, b3=b3)


def _reference(query, positive, negative, p):
    mouth = query @ p["w_mouth"] + p["b_mouth"]
    pos_emb = positive @ p["w_aud"] + p["b_aud"]
    neg_emb = negative @ p["w_aud"] + p["b_aud"]

    def mlp(pair):
        h = jnp.maximum(pair @ p["w1"] + p["b1"], 0.0)
        h = jnp.maximum(h @ p["w2"] + p["b2"], 0.0)
        return jax.nn.sigmoid(h @ p["w3"] + p["b3"])

    pos_x = mlp(jnp.concatenate([mouth, pos_emb], axis=1))
    neg_x = mlp(jnp.concatenate([mouth, neg_emb], axis=1))
    pred = jnp.concatenate([pos_x, neg_x], axis=0).reshape(-1)
    labels = jnp.concatenate([jnp.ones_like(pos_x), jnp.zeros_like(neg_x)], axis=0).reshape(-1)
    pc = jnp.clip(pred, 1e-7, 1.0 - 1e-7)
    loss = -jnp.mean(labels * jnp.log(pc) + (1.0 - labels) * jnp.log(1.0 - pc))
    return loss, pred, labels


if __name__ == "__main__":
    B, DQ, DA = 2, 40, 32  # batch, landmark feature dim, audio feature dim
    kq, kp, kn = jax.random.split(jax.random.PRNGKey(0), 3)
    query = jax.random.normal(kq, (B, DQ), jnp.float32)
    positive = jax.random.normal(kp, (B, DA), jnp.float32)
    negative = jax.random.normal(kn, (B, DA), jnp.float32)

    params = init_params(jax.random.PRNGKey(42), DQ, DA)
    forward = make_binary_classifier_forward(params, DQ, DA)

    loss, pred, labels = forward(query, positive, negative)
    jax.block_until_ready((loss, pred, labels))

    loss_r, pred_r, labels_r = _reference(query, positive, negative, params)
    # No approx reciprocal anymore; remaining difference is f32 accumulation order of
    # the folded weights + EUP tanh vs XLA sigmoid, so the tolerance is tightened.
    assert jnp.allclose(pred, pred_r, atol=1e-4, rtol=1e-4)
    assert jnp.allclose(labels, labels_r)
    assert jnp.allclose(loss, loss_r, atol=1e-4, rtol=1e-4)

    print("KERNEL_OK")
</pallas_src>

<mosaic_0001>
module attributes {stable_mosaic.version = 11 : i64} {
  func.func @binary_classifier_kernel(%arg0: memref<4x72xf32, #tpu.memory_space<vmem>>, %arg1: memref<144x64xf32, #tpu.memory_space<vmem>>, %arg2: memref<1x128xf32, #tpu.memory_space<vmem>>) attributes {dimension_semantics = [], scalar_prefetch = 0 : i64, scratch_operands = 0 : i64, tpu.core_type = #tpu.core_type<tc>} {
    %c0 = arith.constant 0 : index
    %c0_0 = arith.constant 0 : index
    %0 = vector.load %arg0[%c0, %c0_0] : memref<4x72xf32, #tpu.memory_space<vmem>>, vector<4x72xf32>
    %c0_1 = arith.constant 0 : index
    %c0_2 = arith.constant 0 : index
    %1 = vector.load %arg1[%c0_1, %c0_2] : memref<144x64xf32, #tpu.memory_space<vmem>>, vector<72x64xf32>
    %c72 = arith.constant 72 : index
    %c0_3 = arith.constant 0 : index
    %2 = vector.load %arg1[%c72, %c0_3] : memref<144x64xf32, #tpu.memory_space<vmem>>, vector<64x64xf32>
    %c136 = arith.constant 136 : index
    %c0_4 = arith.constant 0 : index
    %3 = vector.load %arg1[%c136, %c0_4] : memref<144x64xf32, #tpu.memory_space<vmem>>, vector<1x64xf32>
    %c137 = arith.constant 137 : index
    %c0_5 = arith.constant 0 : index
    %4 = vector.load %arg1[%c137, %c0_5] : memref<144x64xf32, #tpu.memory_space<vmem>>, vector<1x64xf32>
    %c138 = arith.constant 138 : index
    %c0_6 = arith.constant 0 : index
    %5 = vector.load %arg1[%c138, %c0_6] : memref<144x64xf32, #tpu.memory_space<vmem>>, vector<1x64xf32>
    %c139 = arith.constant 139 : index
    %c0_7 = arith.constant 0 : index
    %6 = vector.load %arg1[%c139, %c0_7] : memref<144x64xf32, #tpu.memory_space<vmem>>, vector<1x1xf32>
    %cst = arith.constant dense<0.000000e+00> : vector<4x64xf32>
    %7 = tpu.matmul %0, %1, %cst {dimension_numbers = #tpu.dot_dimension_numbers<[1], [0], [0], [1], [0, 0, 1, 1], [], []>} : vector<4x72xf32>, vector<72x64xf32>, vector<4x64xf32> -> vector<4x64xf32>
    %8 = vector.broadcast %3 : vector<1x64xf32> to vector<4x64xf32>
    %9 = arith.addf %7, %8 : vector<4x64xf32>
    %cst_8 = arith.constant 0.000000e+00 : f32
    %10 = vector.broadcast %cst_8 : f32 to vector<4x64xf32>
    %11 = arith.maximumf %9, %10 : vector<4x64xf32>
    %cst_9 = arith.constant dense<0.000000e+00> : vector<4x64xf32>
    %12 = tpu.matmul %11, %2, %cst_9 {dimension_numbers = #tpu.dot_dimension_numbers<[1], [0], [0], [1], [0, 0, 1, 1], [], []>} : vector<4x64xf32>, vector<64x64xf32>, vector<4x64xf32> -> vector<4x64xf32>
    %13 = vector.broadcast %4 : vector<1x64xf32> to vector<4x64xf32>
    %14 = arith.addf %12, %13 : vector<4x64xf32>
    %cst_10 = arith.constant 0.000000e+00 : f32
    %15 = vector.broadcast %cst_10 : f32 to vector<4x64xf32>
    %16 = arith.maximumf %14, %15 : vector<4x64xf32>
    %cst_11 = arith.constant dense<0.000000e+00> : vector<1x4xf32>
    %17 = tpu.matmul %5, %16, %cst_11 {dimension_numbers = #tpu.dot_dimension_numbers<[1], [1], [0], [0], [0, 0, 1, 0], [], []>} : vector<1x64xf32>, vector<4x64xf32>, vector<1x4xf32> -> vector<1x4xf32>
    %18 = vector.broadcast %6 : vector<1x1xf32> to vector<1x4xf32>
    %19 = arith.addf %17, %18 : vector<1x4xf32>
    %cst_12 = arith.constant 5.000000e-01 : f32
    %20 = vector.broadcast %cst_12 : f32 to vector<1x4xf32>
    %21 = arith.mulf %20, %19 : vector<1x4xf32>
    %22 = math.tanh %21 : vector<1x4xf32>
    %cst_13 = arith.constant 1.000000e+00 : f32
    %23 = vector.broadcast %cst_13 : f32 to vector<1x4xf32>
    %24 = arith.addf %22, %23 : vector<1x4xf32>
    %cst_14 = arith.constant 5.000000e-01 : f32
    %25 = vector.broadcast %cst_14 : f32 to vector<1x4xf32>
    %26 = arith.mulf %25, %24 : vector<1x4xf32>
    %cst_15 = arith.constant 1.000000e-07 : f32
    %cst_16 = arith.constant 0.99999988 : f32
    %27 = vector.broadcast %cst_15 : f32 to vector<1x4xf32>
    %28 = arith.maximumf %27, %26 : vector<1x4xf32>
    %29 = vector.broadcast %cst_16 : f32 to vector<1x4xf32>
    %30 = arith.minimumf %29, %28 : vector<1x4xf32>
    %31 = tpu.iota {dimensions = array<i32: 1>} : vector<1x4xi32>
    %c2_i32 = arith.constant 2 : i32
    %32 = vector.broadcast %c2_i32 : i32 to vector<1x4xi32>
    %33 = arith.cmpi slt, %31, %32 : vector<1x4xi32>
    %cst_17 = arith.constant 1.000000e+00 : f32
    %34 = vector.broadcast %cst_17 : f32 to vector<1x4xf32>
    %35 = arith.subf %34, %30 : vector<1x4xf32>
    %36 = arith.select %33, %30, %35 : vector<1x4xi1>, vector<1x4xf32>
    %37 = math.log %36 : vector<1x4xf32>
    %38 = vector.shape_cast %37 : vector<1x4xf32> to vector<1x1x4xf32>
    %cst_18 = arith.constant dense<0.000000e+00> : vector<1xf32>
    %39 = vector.multi_reduction <add>, %38, %cst_18 [1, 2] : vector<1x1x4xf32> to vector<1xf32>
    %40 = vector.shape_cast %39 : vector<1xf32> to vector<1x1x1xf32>
    %41 = vector.extract %40[0, 0, 0] : f32 from vector<1x1x1xf32>
    %cst_19 = arith.constant 0.000000e+00 : f32
    %42 = arith.subf %cst_19, %41 : f32
    %cst_20 = arith.constant 4.000000e+00 : f32
    %43 = arith.divf %42, %cst_20 : f32
    %44 = vector.broadcast %43 : f32 to vector<1x128xf32>
    %c0_21 = arith.constant 0 : index
    %c0_22 = arith.constant 0 : index
    %45 = vector.load %arg2[%c0_21, %c0_22] : memref<1x128xf32, #tpu.memory_space<vmem>>, vector<1x128xf32>
    tpu.vector_store %arg2[%c0_21, %c0_22], %44 {strides = array<i32>} : memref<1x128xf32, #tpu.memory_space<vmem>>, vector<1x128xf32>,
    %c0_23 = arith.constant 0 : index
    %c0_24 = arith.constant 0 : index
    %46 = vector.load %arg2[%c0_23, %c0_24] : memref<1x128xf32, #tpu.memory_space<vmem>>, vector<1x4xf32>
    tpu.vector_store %arg2[%c0_23, %c0_24], %26 {strides = array<i32>} : memref<1x128xf32, #tpu.memory_space<vmem>>, vector<1x4xf32>,
    return
  }
}

</mosaic_0001>

<bundles_post_ra>
// kernel: forward.1
= control target key start
LH: loop header
LB: loop body
LE: loop exit
PB: predicated region body
PF: predicated region fallthrough
CT: control target
= control target key end

     0   :  { %7 = vsyncpa [#allocation3], 0  ;;  %s222_s12 = smov [#allocation2]   ;;  %s223_s14 = smov 128   ;;  %s256_s0 = inlined_call_operand.vmem [shape: f32[4,72], index: 0, kind: input, shape index: {}]   ;;  %s257_s1 = inlined_call_operand.hbm [shape: f32[144,64], index: 1, kind: input, shape index: {}]   ;;  %s258_s2 = inlined_call_operand.vmem [shape: f32[1,128], index: 2, kind: output, shape index: {}]  }
   0x1   :  { %s14_s11 = sshll.u32 %s257_s1, 4  ;;  %s16_s13 = sshll.u32 %s222_s12, 4  ;;  %s15_s11 = int_to_ptr.hbm [resolvable:$true] %s14_s11  ;;  %s17_s13 = int_to_ptr.vmem [resolvable:$true] %s16_s13 }
   0x2   :  { %s224_s15 = smov 8  }
   0x3   :  { %22 = dma.hbm_to_vmem [thread:$0]  %s15_s11, 2304, %s17_s13, [#allocation3], %s223_s14, %s223_s14, %s224_s15  }
   0x4   :  { %220 = dma.done.wait [#allocation3], 2304  }
   0x5   :  { %221 = vsyncadd [#allocation3], 4294964992  ;;  %v36_v0 = vld [vmem:[#allocation2 + $0x40] sm:$0xff]  ;;  %v35_v1 = vld [vmem:[#allocation2 + $0x38] sm:$0xff]  ;;  %vm50_vm0 = vcmask 588800   ;;  %vm76_vm1 = vcmask 523264   ;;  %v138_v34 = vlaneseq }
   0x6   :  { %61 = vmatpush.msra.mxu0 %v36_v0  ;;  %v34_v2 = vld [vmem:[#allocation2 + $0x30] sm:$0xff]  ;;  %v44_v3 = vld [vmem:[#allocation2 + $0x80] sm:$0xff]  ;;  %v43_v4 = vld [vmem:[#allocation2 + $0x78] sm:$0xff]  ;;  %v225_v23 = vmov 0   ;;  %vm145_vm3 = vcmask 24576   ;;  %v226_v45 = vmov 4.0  }
   0x7   :  { %v33_v5 = vld [vmem:[#allocation2 + $0x28] sm:$0xff]  ;;  %88 = vmatpush.msra.mxu1 %v44_v3  ;;  %v42_v6 = vld [vmem:[#allocation2 + $0x70] sm:$0xff]  ;;  %v32_v7 = vld [vmem:[#allocation2 + $0x20] sm:$0xff]  ;;  %187 = vset.pattern.permute.xlu0 %v225_v23  ;;  %v139_v37 = vand.u32 127, %v138_v34 }
   0x8   :  { %62 = vmatpush.msra.mxu0 %v35_v1  ;;  %v41_v8 = vld [vmem:[#allocation2 + $0x68] sm:$0xff]  ;;  %v31_v9 = vld [vmem:[#allocation2 + $0x18] sm:$0xff]  ;;  %v40_v10 = vld [vmem:[#allocation2 + $0x60] sm:$0xff] }
   0x9   :  { %89 = vmatpush.msra.mxu1 %v43_v4  ;;  %v30_v11 = vld [vmem:[#allocation2 + $0x10] sm:$0xff]  ;;  %v29_v12 = vld [vmem:[#allocation2 + $0x8] sm:$0xff]  ;;  %v28_v13 = vld [vmem:[#allocation2] sm:$0xff]  ;;  %vm140_vm2 = vcmp.lt.s32.totalorder %v139_v37, 2 }
   0xa   :  { %63 = vmatpush.msra.mxu0 %v34_v2  ;;  %v27_v14 = vld [vmem:[%s256_s0] sm:$0xf]  ;;  %v39_v15 = vld [vmem:[#allocation2 + $0x58] sm:$0xff]  ;;  %v38_v16 = vld [vmem:[#allocation2 + $0x50] sm:$0xff] }
   0xb   :  { %90 = vmatpush.msra.mxu1 %v42_v6  ;;  %v37_v17 = vld [vmem:[#allocation2 + $0x48] sm:$0xff] }
   0xc   :  { %64 = vmatpush.msra.mxu0 %v33_v5  ;;  %v188_v18 = vld [vmem:[#allocation2 + $0x88] ss:$0 sm:$0xff]  ;;  %v48_v22 = vld [vmem:[#allocation2 + $0x8b] sm:$0x1]  ;;  %v189_v24 = vld [vmem:[#allocation2 + $0x89] ss:$0 sm:$0xff] }
   0xd   :  { %91 = vmatpush.msra.mxu1 %v41_v8  ;;  %103 = vperm.xlu0 %187, %v48_v22   ;;  %v47_v28 = vld [vmem:[#allocation2 + $0x8a] sm:$0x1] }
   0xe   :  { %65 = vmatpush.msra.mxu0 %v32_v7 }
   0xf   :  { %92 = vmatpush.msra.mxu1 %v40_v10 }
  0x10   :  { %66 = vmatpush.msra.mxu0 %v31_v9 }
  0x11   :  { %93 = vmatpush.msra.mxu1 %v39_v15 }
  0x12   :  { %67 = vmatpush.msra.mxu0 %v30_v11 }
  0x13   :  { %94 = vmatpush.msra.mxu1 %v38_v16 }
  0x14   :  { %68 = vmatpush.msra.mxu0 %v29_v12 }
  0x15   :  { %95 = vmatpush.msra.mxu1 %v37_v17 }
  0x16   :  { %69 = vmatpush.msra.mxu0 %v28_v13 }
  0x17   :  { %174 = vmatmul.msk.f32.vlgmr.msra.gmra.mxu0 %vm50_vm0, %v27_v14 }
  0x7f   :  { %v104_v29 = vpop.permute.xlu0 %103 }
  0x94   :  { %v71_v19 = vpop.f32.mrf.mxu0 }
  0x95   :  { %v72_v20 = vadd.f32 %v188_v18, %v71_v19 }
  0x97   :  { %v74_v21 = vmax.f32 %v72_v20, 0.0 }
  0x99   :  { %175 = vmatmul.msk.f32.vlgmr.msra.gmra.mxu1 %vm76_vm1, %v74_v21 }
 0x116   :  { %v97_v25 = vpop.f32.mrf.mxu1 }
 0x117   :  { %v98_v26 = vadd.f32 %v189_v24, %v97_v25 }
 0x119   :  { %v100_v27 = vmax.f32 %v98_v26, 0.0 }
 0x11b   :  { %176 = vmatpush.xpose.msk.msra.mxu2 %vm76_vm1, %v100_v27 }
 0x11e   :  { %177 = vmatmul.msk.f32.vlgmr.msra.gmra.mxu2 %vm76_vm1, %v47_v28 }
 0x1a1   :  { %v129_v30 = vpop.f32.mrf.mxu2 }
 0x1a2   :  { %v130_v31 = vadd.f32 %v129_v30, %v104_v29 }
 0x1a4   :  { %v132_v32 = vmul.f32 0.5, %v130_v31 }
 0x1a6   :  { %190 = vtanh.f32 %v132_v32 }
 0x1ac   :  { %v191_v33 = vpop.eup %190 }
 0x1ad   :  { %v134_v35 = vadd.f32 1.0, %v191_v33 }
 0x1af   :  { %v135_v36 = vmul.f32 0.5, %v134_v35 }
 0x1b1   :  { %v136_v38 = vmax.f32 %v135_v36, 1e-07 }
 0x1b3   :  { %v137_v39 = vmin.f32 %v136_v38, 0.9999999 }
 0x1b5   :  { %v141_v40 = vsub.f32 1.0, %v137_v39 }
 0x1b7   :  { %v142_v41 = vsel %vm140_vm2, %v137_v39, %v141_v40 }
 0x1b8   :  { %192 = vlog2.f32 %v142_v41 }
 0x1b9   :  { %194 = vrcp.f32 %v226_v45 }
 0x1be   :  { %v193_v42 = vpop.eup %192 }
 0x1bf   :  { %v144_v43 = vmul.f32 0.6931472, %v193_v42  ;;  %v195_v46 = vpop.eup %194 }
 0x1c0   :  { %v158_v47 = vmul.f32 4.0, %v195_v46  ;;  %vm162_vm4 = vweird.f32 %v195_v46 }
 0x1c1   :  { %v146_v44 = vsel %vm145_vm3, %v144_v43, 0.0 }
 0x1c2   :  { %147 = vadd.xlane.f32.xlu0 %v146_v44  ;;  %v159_v48 = vsub.f32 1.0, %v158_v47 }
 0x1c4   :  { %v160_v52 = vmul.f32 %v195_v46, %v159_v48 }
 0x1c6   :  { %v161_v55 = vadd.f32 %v195_v46, %v160_v52 }
 0x1c8   :  { %v163_v58 = vsel %vm162_vm4, %v195_v46, %v161_v55 }
 0x235   :  { %v148_v49 = vpop.xlane.xlu0 %147 }
 0x236   :  { %v149_v50 = vrot.slane %v148_v49, 4 }
 0x238   :  { %v150_v51 = vadd.f32 %v149_v50, %v148_v49 }
 0x23a   :  { %v151_v53 = vrot.slane %v150_v51, 2 }
 0x23c   :  { %v152_v54 = vadd.f32 %v151_v53, %v150_v51 }
 0x23e   :  { %v153_v56 = vrot.slane %v152_v54, 1 }
 0x240   :  { %v154_v57 = vadd.f32 %v153_v56, %v152_v54 }
 0x242   :  { %178 = vpush %v154_v57 }
 0x243   :  { %180 = vpush %v163_v58 }
 0x273   :  { %s179_s0 = spop %178 }
 0x274   :  { %s156_s17 = ssub.f32 0.0, %s179_s0  ;;  %s181_s18 = spop %180 }
 0x276   :  { %s165_s19 = smul.f32 %s181_s18, %s156_s17 }
 0x278   :  { %v166_v59 = vstv %s165_s19 }
 0x279   :  { %167 = vst [vmem:[%s258_s2] sm:$0x1] %v166_v59 }
 0x27a   :  { %168 = vst.msk [vmem:[%s258_s2] sm:$0x1] %vm145_vm3, %v135_v36 }
 0x27b   :  { %173 = vsyncpa [#allocation3], 1 }

</bundles_post_ra>
